<compile_context>
chip_gen: v7x
topology: tpu7x:2x2x1
jax: 0.10.0
libtpu: 0.0.40
codegen_flags: <defaults>
</compile_context>

<pallas_src>
import functools

import jax
import jax.numpy as jnp
from jax.experimental import pallas as pl
from jax.experimental.pallas import tpu as pltpu

NEG_SLOPE_DEFAULT = 0.2
BN_EPS = 1e-5
MXU_DTYPE = jnp.bfloat16           # MXU operand dtype; accumulation/epilogue stay f32
VMEM_LIMIT = 32 * 1024 * 1024


def _round_up(x, m):
    return (x + m - 1) // m * m


def _leaky(v, neg_slope):
    return jnp.where(v >= 0, v, v * neg_slope)


# ----------------------------- Pallas kernels ------------------------------------

def _conv3x3_kernel(*refs, mo, wp, cin, pre_act, act, neg_slope,
                    has_residual, has_shortcut, compute_dtype):
    """Fused 3x3 'same' conv on a zero-padded, row-flattened NHWC image.

    x_ref holds one image padded by 1 pixel on each border and flattened to (Lpad, Cin) with
    flat row index = y * (W+2) + x.  Output row r = h*(W+2) + w holds the conv result for output
    pixel (h, w); rows with w >= W are don't-care and are sliced off outside the kernel.
    """
    it = iter(refs)
    x_ref, w_ref, b_ref = next(it), next(it), next(it)
    res_ref = next(it) if has_residual else None
    if has_shortcut:
        wsc_ref, bsc_ref = next(it), next(it)
    o_ref = next(it)
    sc_ref = next(it) if has_shortcut else None

    acc = jnp.zeros(o_ref.shape, jnp.float32)
    for ky in range(3):
        for kx in range(3):
            start = ky * wp + kx
            tap = x_ref[start:start + mo, :]
            if pre_act == "leaky":                 # zero-preserving -> safe on zero padding
                tap = _leaky(tap, neg_slope)
            wt = w_ref[ky * 3 + kx]                # (Cin, Cout), already in compute_dtype
            if cin == 1:
                # VPU broadcast path (avoids a K=1 matmul); keep the product in f32.
                acc = acc + tap * wt.astype(jnp.float32)
            else:
                acc = acc + jnp.dot(tap.astype(compute_dtype), wt,
                                    preferred_element_type=jnp.float32)

    y = acc + b_ref[...]
    if act == "leaky":
        y = _leaky(y, neg_slope)
    elif act == "relu":
        y = jnp.maximum(y, 0.0)
    elif act == "tanh":
        y = jnp.tanh(y)
    if has_residual:
        y = y + res_ref[...]
    o_ref[...] = y

    if has_shortcut:
        # 1x1 shortcut conv on the raw (un-preactivated) input: center tap of the slab.
        ctr = x_ref[wp + 1:wp + 1 + mo, :]
        if cin == 1:
            sc = ctr * wsc_ref[...].astype(jnp.float32)
        else:
            sc = jnp.dot(ctr.astype(compute_dtype), wsc_ref[...],
                         preferred_element_type=jnp.float32)
        sc_ref[...] = sc + bsc_ref[...]


def _modulate_kernel(*refs, eps, neg_slope, cin, has_shortcut, compute_dtype):
    """Param-free BatchNorm (batch statistics) + SPADE modulation + LeakyReLU, optionally fused
    with the resblock's 1x1 shortcut conv applied to the raw input."""
    it = iter(refs)
    x_ref, g_ref, b_ref = next(it), next(it), next(it)
    if has_shortcut:
        wsc_ref, bsc_ref = next(it), next(it)
    o_ref = next(it)
    sc_ref = next(it) if has_shortcut else None

    x = x_ref[...]
    mean = jnp.mean(x, axis=0, keepdims=True)
    var = jnp.mean((x - mean) ** 2, axis=0, keepdims=True)
    xn = (x - mean) * jax.lax.rsqrt(var + eps)
    y = xn * (1.0 + g_ref[...]) + b_ref[...]
    o_ref[...] = _leaky(y, neg_slope)

    if has_shortcut:
        if cin == 1:
            sc = x * wsc_ref[...].astype(jnp.float32)
        else:
            sc = jnp.dot(x.astype(compute_dtype), wsc_ref[...],
                         preferred_element_type=jnp.float32)
        sc_ref[...] = sc + bsc_ref[...]


# ----------------------------- wrappers -------------------------------------------

def _spatial_to_flat_rows(t):
    """(N, H, W, C) -> (N, H*(W+2), C) with row = h*(W+2)+w (extra columns are zero)."""
    n, h, w, c = t.shape
    return jnp.pad(t, ((0, 0), (0, 0), (0, 2), (0, 0))).reshape(n, h * (w + 2), c)


def _flat_rows_to_spatial(flat, h, w):
    n, _, c = flat.shape
    return flat.reshape(n, h, w + 2, c)[:, :, :w, :]


def conv3x3(x, w, b, *, act="none", pre_act="none", residual=None, shortcut=None,
            neg_slope=NEG_SLOPE_DEFAULT, compute_dtype=MXU_DTYPE):
    """Fused 3x3 'same' conv (NHWC activations, HWIO weights).

    pre_act  : 'leaky' applied to the conv input taps (zero-preserving, padding-safe)
    act      : activation applied after the bias
    residual : NHWC tensor added after the activation (fused residual add)
    shortcut : (w_sc, b_sc) -> second output = 1x1 conv of the raw input (shares the slab read)
    """
    n, h, wd, cin = x.shape
    cout = w.shape[-1]
    wp = wd + 2
    mo = h * wp
    lraw = (h + 2) * wp
    lpad = _round_up(lraw + 2, 8)      # last taps of the last garbage rows reach 2 rows past the slab

    xf = jnp.pad(x.astype(jnp.float32), ((0, 0), (1, 1), (1, 1), (0, 0))).reshape(n, lraw, cin)
    xf = jnp.pad(xf, ((0, 0), (0, lpad - lraw), (0, 0)))

    inputs = [xf,
              w.reshape(9, cin, cout).astype(compute_dtype),
              b.reshape(1, cout).astype(jnp.float32)]
    in_specs = [pl.BlockSpec((None, lpad, cin), lambda i: (i, 0, 0)),
                pl.BlockSpec((9, cin, cout), lambda i: (0, 0, 0)),
                pl.BlockSpec((1, cout), lambda i: (0, 0))]

    has_res = residual is not None
    if has_res:
        inputs.append(_spatial_to_flat_rows(residual.astype(jnp.float32)))
        in_specs.append(pl.BlockSpec((None, mo, cout), lambda i: (i, 0, 0)))

    has_sc = shortcut is not None
    if has_sc:
        wsc, bsc = shortcut
        csc = wsc.shape[-1]
        inputs += [wsc.reshape(cin, csc).astype(compute_dtype),
                   bsc.reshape(1, csc).astype(jnp.float32)]
        in_specs += [pl.BlockSpec((cin, csc), lambda i: (0, 0)),
                     pl.BlockSpec((1, csc), lambda i: (0, 0))]

    out_shape = [jax.ShapeDtypeStruct((n, mo, cout), jnp.float32)]
    out_specs = [pl.BlockSpec((None, mo, cout), lambda i: (i, 0, 0))]
    if has_sc:
        out_shape.append(jax.ShapeDtypeStruct((n, mo, csc), jnp.float32))
        out_specs.append(pl.BlockSpec((None, mo, csc), lambda i: (i, 0, 0)))

    kern = functools.partial(_conv3x3_kernel, mo=mo, wp=wp, cin=cin,
                             pre_act=pre_act, act=act, neg_slope=neg_slope,
                             has_residual=has_res, has_shortcut=has_sc,
                             compute_dtype=compute_dtype)
    outs = pl.pallas_call(
        kern,
        grid=(n,),
        in_specs=in_specs,
        out_specs=out_specs,
        out_shape=out_shape,
        compiler_params=pltpu.CompilerParams(
            dimension_semantics=("parallel",),
            vmem_limit_bytes=VMEM_LIMIT),
    )(*inputs)

    main = _flat_rows_to_spatial(outs[0], h, wd)
    if has_sc:
        return main, _flat_rows_to_spatial(outs[1], h, wd)
    return main


def spade_modulate_leaky(x, gamma, beta, *, shortcut=None, eps=BN_EPS,
                         neg_slope=NEG_SLOPE_DEFAULT, compute_dtype=MXU_DTYPE):
    """leaky(BN(x) * (1 + gamma) + beta), optionally also returning the 1x1 shortcut conv of x."""
    n, h, w, c = x.shape
    m = n * h * w
    inputs = [x.reshape(m, c).astype(jnp.float32),
              gamma.reshape(m, c).astype(jnp.float32),
              beta.reshape(m, c).astype(jnp.float32)]
    in_specs = [pl.BlockSpec((m, c), lambda i: (0, 0)) for _ in range(3)]

    has_sc = shortcut is not None
    if has_sc:
        wsc, bsc = shortcut
        csc = wsc.shape[-1]
        inputs += [wsc.reshape(c, csc).astype(compute_dtype),
                   bsc.reshape(1, csc).astype(jnp.float32)]
        in_specs += [pl.BlockSpec((c, csc), lambda i: (0, 0)),
                     pl.BlockSpec((1, csc), lambda i: (0, 0))]

    out_shape = [jax.ShapeDtypeStruct((m, c), jnp.float32)]
    out_specs = [pl.BlockSpec((m, c), lambda i: (0, 0))]
    if has_sc:
        out_shape.append(jax.ShapeDtypeStruct((m, csc), jnp.float32))
        out_specs.append(pl.BlockSpec((m, csc), lambda i: (0, 0)))

    kern = functools.partial(_modulate_kernel, eps=eps, neg_slope=neg_slope, cin=c,
                             has_shortcut=has_sc, compute_dtype=compute_dtype)
    outs = pl.pallas_call(
        kern,
        grid=(1,),
        in_specs=in_specs,
        out_specs=out_specs,
        out_shape=out_shape,
        compiler_params=pltpu.CompilerParams(
            dimension_semantics=("arbitrary",),
            vmem_limit_bytes=VMEM_LIMIT),
    )(*inputs)

    main = outs[0].reshape(n, h, w, c)
    if has_sc:
        return main, outs[1].reshape(n, h, w, csc)
    return main


def upsample2(x):
    # TODO(synk): nearest x2 upsample kept as XLA glue (pure data movement); XLA fuses it with the
    #             padded-slab construction feeding the next conv, so no extra HBM round trip.
    return jnp.repeat(jnp.repeat(x, 2, axis=1), 2, axis=2)


# ----------------------------- blocks ---------------------------------------------

def resblock_up(x, p, neg_slope, pre_activation=True, up_size=2):
    xin = upsample2(x) if up_size > 1 else x
    # conv1 (with fused pre-activation LeakyReLU) and the 1x1 shortcut share one slab read.
    h1, sc = conv3x3(xin, p["conv1"]["w"], p["conv1"]["b"],
                     pre_act=("leaky" if pre_activation else "none"), act="leaky",
                     shortcut=(p["sc"]["w"], p["sc"]["b"]), neg_slope=neg_slope)
    # conv2 with the residual add fused into its epilogue.
    return conv3x3(h1, p["conv2"]["w"], p["conv2"]["b"], act="none",
                   residual=sc, neg_slope=neg_slope)


def spade_gamma_beta(cond, sp, neg_slope):
    """gamma/beta maps of a SPADE block.  `cond` is the raw thermal feature; the LeakyReLU the
    generator applies to it is fused as the shared conv's pre-activation.  The gamma and beta
    convs are fused into one matmul (Cout concatenated)."""
    hid = conv3x3(cond, sp["shared"]["w"], sp["shared"]["b"],
                  pre_act="leaky", act="relu", neg_slope=neg_slope)
    w_gb = jnp.concatenate([sp["gamma"]["w"], sp["beta"]["w"]], axis=-1)
    b_gb = jnp.concatenate([sp["gamma"]["b"], sp["beta"]["b"]], axis=-1)
    gb = conv3x3(hid, w_gb, b_gb, act="none", neg_slope=neg_slope)
    nc = sp["gamma"]["w"].shape[-1]
    return gb[..., :nc], gb[..., nc:]


def resblock_up_spade_sr(x, c_low, c_high, p, neg_slope):
    g1, b1 = spade_gamma_beta(c_low, p["spade1"], neg_slope)
    # BN + SPADE modulation + LeakyReLU + low-res 1x1 shortcut, all in one kernel.
    h0, sc_low = spade_modulate_leaky(x, g1, b1, shortcut=(p["sc"]["w"], p["sc"]["b"]),
                                      neg_slope=neg_slope)
    h1 = conv3x3(upsample2(h0), p["conv1"]["w"], p["conv1"]["b"], act="none",
                 neg_slope=neg_slope)
    g2, b2 = spade_gamma_beta(c_high, p["spade2"], neg_slope)
    h1m = spade_modulate_leaky(h1, g2, b2, neg_slope=neg_slope)
    # 1x1 shortcut commutes with nearest upsampling: sc(up(x)) == up(sc(x)).
    return conv3x3(h1m, p["conv2"]["w"], p["conv2"]["b"], act="none",
                   residual=upsample2(sc_low), neg_slope=neg_slope)


# ----------------------------- parameter init -------------------------------------

def _conv_params(key, kh, kw, cin, cout, bias=True):
    wkey, bkey = jax.random.split(key)
    fan_in = kh * kw * cin
    w = jax.random.normal(wkey, (kh, kw, cin, cout), jnp.float32) / jnp.sqrt(float(fan_in))
    b = (0.01 * jax.random.normal(bkey, (cout,), jnp.float32)) if bias else jnp.zeros((cout,), jnp.float32)
    return {"w": w, "b": b}


def _resblock_up_params(key, cin, cout):
    k1, k2, k3 = jax.random.split(key, 3)
    return {"conv1": _conv_params(k1, 3, 3, cin, cout),
            "conv2": _conv_params(k2, 3, 3, cout, cout),
            "sc": _conv_params(k3, 1, 1, cin, cout)}


def _spade_params(key, norm_ch, label_ch, hidden_ch):
    k1, k2, k3 = jax.random.split(key, 3)
    return {"shared": _conv_params(k1, 3, 3, label_ch, hidden_ch),
            "gamma": _conv_params(k2, 3, 3, hidden_ch, norm_ch),
            "beta": _conv_params(k3, 3, 3, hidden_ch, norm_ch)}


def _spsr_params(key, hidden, label_ch, cin, cout):
    k1, k2, k3, k4, k5 = jax.random.split(key, 5)
    return {"spade1": _spade_params(k1, cin, label_ch, hidden),
            "spade2": _spade_params(k2, cout, label_ch, hidden),
            "conv1": _conv_params(k3, 3, 3, cin, cout),
            "conv2": _conv_params(k4, 3, 3, cout, cout),
            "sc": _conv_params(k5, 1, 1, cin, cout)}


def init_generator_params(key, cfg):
    gc = cfg["G_CONV_CH"]
    th = cfg["G_CONV_THERMAL_CH"]
    keys = jax.random.split(key, 10)
    return {
        "res_up_c1": _resblock_up_params(keys[0], cfg["G_IN_CH"], th),
        "res_up_c2": _resblock_up_params(keys[1], th, th),
        "res_up_c3": _resblock_up_params(keys[2], th, th),
        "res_up_c4": _resblock_up_params(keys[3], th, th),
        "linear_w": jax.random.normal(keys[4], (cfg["G_Z_DIM"], 5 * 8 * gc * 4),
                                      jnp.float32) / jnp.sqrt(float(cfg["G_Z_DIM"])),
        "spsr1": _spsr_params(keys[5], gc * 4, th, gc * 4, gc * 4),
        "spsr2": _spsr_params(keys[6], gc * 4, th, gc * 4, gc * 2),
        "spsr3": _spsr_params(keys[7], gc * 2, th, gc * 2, gc),
        "spadeBN": _spade_params(keys[8], gc, th, gc),
        "conv": _conv_params(keys[9], 3, 3, gc, 3),
    }


# ----------------------------- forward pass ----------------------------------------

def generator_spade_sr_forward(params, cfg, thermal_input_nchw, noise):
    neg = cfg["RELU_NEG_SLOPE"]
    gc = cfg["G_CONV_CH"]
    n = thermal_input_nchw.shape[0]

    th = jnp.transpose(thermal_input_nchw, (0, 2, 3, 1))      # NCHW -> NHWC

    c1 = resblock_up(th, params["res_up_c1"], neg, pre_activation=False, up_size=1)
    c2 = resblock_up(c1, params["res_up_c2"], neg)
    c3 = resblock_up(c2, params["res_up_c3"], neg)
    c4 = resblock_up(c3, params["res_up_c4"], neg)

    # TODO(synk): (B, Z) x (Z, 1280) linear left to XLA — too small to amortize a pallas_call.
    x = jnp.dot(noise.astype(jnp.float32), params["linear_w"],
                preferred_element_type=jnp.float32)
    x = x.reshape(n, gc * 4, 5, 8)          # matches torch .view(-1, C, 5, 8)
    x = jnp.transpose(x, (0, 2, 3, 1))      # to NHWC

    # NOTE: the LeakyReLU applied to c1..c4 in the reference is fused into the SPADE shared convs.
    x = resblock_up_spade_sr(x, c1, c2, params["spsr1"], neg)
    x = resblock_up_spade_sr(x, c2, c3, params["spsr2"], neg)
    x = resblock_up_spade_sr(x, c3, c4, params["spsr3"], neg)

    g, b = spade_gamma_beta(c4, params["spadeBN"], neg)
    x = spade_modulate_leaky(x, g, b, neg_slope=neg)           # spadeBN + final LeakyReLU
    out = conv3x3(x, params["conv"]["w"], params["conv"]["b"], act="tanh", neg_slope=neg)
    return jnp.transpose(out, (0, 3, 1, 2))                    # back to NCHW


# ----------------------------- self checks -----------------------------------------

def _self_check_conv():
    """Validate the in-kernel 9-tap conv against lax.conv (f32 operands, loose tolerance)."""
    key = jax.random.PRNGKey(42)
    k1, k2, k3 = jax.random.split(key, 3)
    x = jax.random.normal(k1, (2, 6, 9, 5), jnp.float32)
    w = 0.1 * jax.random.normal(k2, (3, 3, 5, 7), jnp.float32)
    b = 0.1 * jax.random.normal(k3, (7,), jnp.float32)
    got = conv3x3(x, w, b, act="none", compute_dtype=jnp.float32)
    ref = jax.lax.conv_general_dilated(
        x, w, (1, 1), "SAME", dimension_numbers=("NHWC", "HWIO", "NHWC"),
        precision=jax.lax.Precision.HIGHEST) + b
    assert bool(jnp.allclose(got, ref, atol=5e-2, rtol=5e-2)), \
        float(jnp.max(jnp.abs(got - ref)))


def _self_check_modulate():
    """Validate the fused BN + SPADE-modulation + LeakyReLU kernel against a pure-JAX reference."""
    key = jax.random.PRNGKey(7)
    k1, k2, k3 = jax.random.split(key, 3)
    x = jax.random.normal(k1, (2, 5, 8, 16), jnp.float32)
    g = 0.3 * jax.random.normal(k2, (2, 5, 8, 16), jnp.float32)
    b = 0.3 * jax.random.normal(k3, (2, 5, 8, 16), jnp.float32)
    got = spade_modulate_leaky(x, g, b, neg_slope=NEG_SLOPE_DEFAULT,
                               compute_dtype=jnp.float32)
    xf = x.reshape(-1, 16)
    mean = jnp.mean(xf, axis=0)
    var = jnp.mean((xf - mean) ** 2, axis=0)
    xn = ((xf - mean) / jnp.sqrt(var + BN_EPS)).reshape(x.shape)
    y = xn * (1.0 + g) + b
    ref = jnp.where(y >= 0, y, y * NEG_SLOPE_DEFAULT)
    assert bool(jnp.allclose(got, ref, atol=1e-3, rtol=1e-3)), \
        float(jnp.max(jnp.abs(got - ref)))


# ----------------------------- main -------------------------------------------------

if __name__ == "__main__":
    _self_check_conv()
    _self_check_modulate()

    cfg = dict(G_IN_CH=1, G_CONV_THERMAL_CH=8, G_CONV_CH=8, G_Z_DIM=32,
               RELU_NEG_SLOPE=0.2)

    key = jax.random.PRNGKey(0)
    kp, kt, kn = jax.random.split(key, 3)
    params = init_generator_params(kp, cfg)

    # thermal input at 5x8 (matches the 5x8 noise-projection grid), noise (N, Z)
    thermal_input = jax.random.normal(kt, (2, cfg["G_IN_CH"], 5, 8), jnp.float32)
    noise = jax.random.normal(kn, (2, cfg["G_Z_DIM"]), jnp.float32)

    fwd = jax.jit(lambda p, t, z: generator_spade_sr_forward(p, cfg, t, z))
    out = fwd(params, thermal_input, noise)
    out = jax.block_until_ready(out)

    assert out.shape == (2, 3, 40, 64), out.shape
    assert bool(jnp.all(jnp.isfinite(out)))
    assert bool(jnp.all(jnp.abs(out) <= 1.0))  # tanh output range
    print("KERNEL_OK")
</pallas_src>

<mosaic_0001>
module attributes {stable_mosaic.version = 11 : i64} {
  func.func @_conv3x3_kernel(%arg0: i32, %arg1: memref<1x96x5xf32, #tpu.memory_space<vmem>>, %arg2: memref<9x5x7xf32, #tpu.memory_space<vmem>>, %arg3: memref<1x7xf32, #tpu.memory_space<vmem>>, %arg4: memref<1x66x7xf32, #tpu.memory_space<vmem>>) attributes {dimension_semantics = [#tpu.dimension_semantics<parallel>], iteration_bounds = array<i64: 2>, scalar_prefetch = 0 : i64, scratch_operands = 0 : i64, tpu.core_type = #tpu.core_type<tc>, window_params = [{transform_indices = @transform_0, window_bounds = array<i64: 1, 96, 5>}, {pipeline_mode = #tpu.pipeline_mode<synchronous>, transform_indices = @transform_1, window_bounds = array<i64: 9, 5, 7>}, {pipeline_mode = #tpu.pipeline_mode<synchronous>, transform_indices = @transform_2, window_bounds = array<i64: 1, 7>}, {transform_indices = @transform_3, window_bounds = array<i64: 1, 66, 7>}]} {
    %cst = arith.constant 0.000000e+00 : f32
    %0 = vector.broadcast %cst : f32 to vector<66x7xf32>
    %c0 = arith.constant 0 : index
    %c0_0 = arith.constant 0 : index
    %c0_1 = arith.constant 0 : index
    %1 = vector.load %arg1[%c0, %c0_0, %c0_1] : memref<1x96x5xf32, #tpu.memory_space<vmem>>, vector<1x66x5xf32>
    %2 = vector.shape_cast %1 : vector<1x66x5xf32> to vector<66x5xf32>
    %c0_2 = arith.constant 0 : index
    %c0_3 = arith.constant 0 : index
    %c0_4 = arith.constant 0 : index
    %3 = vector.load %arg2[%c0_2, %c0_3, %c0_4] : memref<9x5x7xf32, #tpu.memory_space<vmem>>, vector<1x5x7xf32>
    %4 = vector.shape_cast %3 : vector<1x5x7xf32> to vector<5x7xf32>
    %cst_5 = arith.constant dense<0.000000e+00> : vector<66x7xf32>
    %5 = tpu.matmul %2, %4, %cst_5 {dimension_numbers = #tpu.dot_dimension_numbers<[1], [0], [0], [1], [0, 0, 1, 1], [], []>} : vector<66x5xf32>, vector<5x7xf32>, vector<66x7xf32> -> vector<66x7xf32>
    %6 = arith.addf %0, %5 : vector<66x7xf32>
    %c0_6 = arith.constant 0 : index
    %c1 = arith.constant 1 : index
    %c0_7 = arith.constant 0 : index
    %7 = vector.load %arg1[%c0_6, %c1, %c0_7] : memref<1x96x5xf32, #tpu.memory_space<vmem>>, vector<1x66x5xf32>
    %8 = vector.shape_cast %7 : vector<1x66x5xf32> to vector<66x5xf32>
    %c1_8 = arith.constant 1 : index
    %c0_9 = arith.constant 0 : index
    %c0_10 = arith.constant 0 : index
    %9 = vector.load %arg2[%c1_8, %c0_9, %c0_10] : memref<9x5x7xf32, #tpu.memory_space<vmem>>, vector<1x5x7xf32>
    %10 = vector.shape_cast %9 : vector<1x5x7xf32> to vector<5x7xf32>
    %cst_11 = arith.constant dense<0.000000e+00> : vector<66x7xf32>
    %11 = tpu.matmul %8, %10, %cst_11 {dimension_numbers = #tpu.dot_dimension_numbers<[1], [0], [0], [1], [0, 0, 1, 1], [], []>} : vector<66x5xf32>, vector<5x7xf32>, vector<66x7xf32> -> vector<66x7xf32>
    %12 = arith.addf %6, %11 : vector<66x7xf32>
    %c0_12 = arith.constant 0 : index
    %c2 = arith.constant 2 : index
    %c0_13 = arith.constant 0 : index
    %13 = vector.load %arg1[%c0_12, %c2, %c0_13] : memref<1x96x5xf32, #tpu.memory_space<vmem>>, vector<1x66x5xf32>
    %14 = vector.shape_cast %13 : vector<1x66x5xf32> to vector<66x5xf32>
    %c2_14 = arith.constant 2 : index
    %c0_15 = arith.constant 0 : index
    %c0_16 = arith.constant 0 : index
    %15 = vector.load %arg2[%c2_14, %c0_15, %c0_16] : memref<9x5x7xf32, #tpu.memory_space<vmem>>, vector<1x5x7xf32>
    %16 = vector.shape_cast %15 : vector<1x5x7xf32> to vector<5x7xf32>
    %cst_17 = arith.constant dense<0.000000e+00> : vector<66x7xf32>
    %17 = tpu.matmul %14, %16, %cst_17 {dimension_numbers = #tpu.dot_dimension_numbers<[1], [0], [0], [1], [0, 0, 1, 1], [], []>} : vector<66x5xf32>, vector<5x7xf32>, vector<66x7xf32> -> vector<66x7xf32>
    %18 = arith.addf %12, %17 : vector<66x7xf32>
    %c0_18 = arith.constant 0 : index
    %c11 = arith.constant 11 : index
    %c0_19 = arith.constant 0 : index
    %19 = vector.load %arg1[%c0_18, %c11, %c0_19] : memref<1x96x5xf32, #tpu.memory_space<vmem>>, vector<1x66x5xf32>
    %20 = vector.shape_cast %19 : vector<1x66x5xf32> to vector<66x5xf32>
    %c3 = arith.constant 3 : index
    %c0_20 = arith.constant 0 : index
    %c0_21 = arith.constant 0 : index
    %21 = vector.load %arg2[%c3, %c0_20, %c0_21] : memref<9x5x7xf32, #tpu.memory_space<vmem>>, vector<1x5x7xf32>
    %22 = vector.shape_cast %21 : vector<1x5x7xf32> to vector<5x7xf32>
    %cst_22 = arith.constant dense<0.000000e+00> : vector<66x7xf32>
    %23 = tpu.matmul %20, %22, %cst_22 {dimension_numbers = #tpu.dot_dimension_numbers<[1], [0], [0], [1], [0, 0, 1, 1], [], []>} : vector<66x5xf32>, vector<5x7xf32>, vector<66x7xf32> -> vector<66x7xf32>
    %24 = arith.addf %18, %23 : vector<66x7xf32>
    %c0_23 = arith.constant 0 : index
    %c12 = arith.constant 12 : index
    %c0_24 = arith.constant 0 : index
    %25 = vector.load %arg1[%c0_23, %c12, %c0_24] : memref<1x96x5xf32, #tpu.memory_space<vmem>>, vector<1x66x5xf32>
    %26 = vector.shape_cast %25 : vector<1x66x5xf32> to vector<66x5xf32>
    %c4 = arith.constant 4 : index
    %c0_25 = arith.constant 0 : index
    %c0_26 = arith.constant 0 : index
    %27 = vector.load %arg2[%c4, %c0_25, %c0_26] : memref<9x5x7xf32, #tpu.memory_space<vmem>>, vector<1x5x7xf32>
    %28 = vector.shape_cast %27 : vector<1x5x7xf32> to vector<5x7xf32>
    %cst_27 = arith.constant dense<0.000000e+00> : vector<66x7xf32>
    %29 = tpu.matmul %26, %28, %cst_27 {dimension_numbers = #tpu.dot_dimension_numbers<[1], [0], [0], [1], [0, 0, 1, 1], [], []>} : vector<66x5xf32>, vector<5x7xf32>, vector<66x7xf32> -> vector<66x7xf32>
    %30 = arith.addf %24, %29 : vector<66x7xf32>
    %c0_28 = arith.constant 0 : index
    %c13 = arith.constant 13 : index
    %c0_29 = arith.constant 0 : index
    %31 = vector.load %arg1[%c0_28, %c13, %c0_29] : memref<1x96x5xf32, #tpu.memory_space<vmem>>, vector<1x66x5xf32>
    %32 = vector.shape_cast %31 : vector<1x66x5xf32> to vector<66x5xf32>
    %c5 = arith.constant 5 : index
    %c0_30 = arith.constant 0 : index
    %c0_31 = arith.constant 0 : index
    %33 = vector.load %arg2[%c5, %c0_30, %c0_31] : memref<9x5x7xf32, #tpu.memory_space<vmem>>, vector<1x5x7xf32>
    %34 = vector.shape_cast %33 : vector<1x5x7xf32> to vector<5x7xf32>
    %cst_32 = arith.constant dense<0.000000e+00> : vector<66x7xf32>
    %35 = tpu.matmul %32, %34, %cst_32 {dimension_numbers = #tpu.dot_dimension_numbers<[1], [0], [0], [1], [0, 0, 1, 1], [], []>} : vector<66x5xf32>, vector<5x7xf32>, vector<66x7xf32> -> vector<66x7xf32>
    %36 = arith.addf %30, %35 : vector<66x7xf32>
    %c0_33 = arith.constant 0 : index
    %c22 = arith.constant 22 : index
    %c0_34 = arith.constant 0 : index
    %37 = vector.load %arg1[%c0_33, %c22, %c0_34] : memref<1x96x5xf32, #tpu.memory_space<vmem>>, vector<1x66x5xf32>
    %38 = vector.shape_cast %37 : vector<1x66x5xf32> to vector<66x5xf32>
    %c6 = arith.constant 6 : index
    %c0_35 = arith.constant 0 : index
    %c0_36 = arith.constant 0 : index
    %39 = vector.load %arg2[%c6, %c0_35, %c0_36] : memref<9x5x7xf32, #tpu.memory_space<vmem>>, vector<1x5x7xf32>
    %40 = vector.shape_cast %39 : vector<1x5x7xf32> to vector<5x7xf32>
    %cst_37 = arith.constant dense<0.000000e+00> : vector<66x7xf32>
    %41 = tpu.matmul %38, %40, %cst_37 {dimension_numbers = #tpu.dot_dimension_numbers<[1], [0], [0], [1], [0, 0, 1, 1], [], []>} : vector<66x5xf32>, vector<5x7xf32>, vector<66x7xf32> -> vector<66x7xf32>
    %42 = arith.addf %36, %41 : vector<66x7xf32>
    %c0_38 = arith.constant 0 : index
    %c23 = arith.constant 23 : index
    %c0_39 = arith.constant 0 : index
    %43 = vector.load %arg1[%c0_38, %c23, %c0_39] : memref<1x96x5xf32, #tpu.memory_space<vmem>>, vector<1x66x5xf32>
    %44 = vector.shape_cast %43 : vector<1x66x5xf32> to vector<66x5xf32>
    %c7 = arith.constant 7 : index
    %c0_40 = arith.constant 0 : index
    %c0_41 = arith.constant 0 : index
    %45 = vector.load %arg2[%c7, %c0_40, %c0_41] : memref<9x5x7xf32, #tpu.memory_space<vmem>>, vector<1x5x7xf32>
    %46 = vector.shape_cast %45 : vector<1x5x7xf32> to vector<5x7xf32>
    %cst_42 = arith.constant dense<0.000000e+00> : vector<66x7xf32>
    %47 = tpu.matmul %44, %46, %cst_42 {dimension_numbers = #tpu.dot_dimension_numbers<[1], [0], [0], [1], [0, 0, 1, 1], [], []>} : vector<66x5xf32>, vector<5x7xf32>, vector<66x7xf32> -> vector<66x7xf32>
    %48 = arith.addf %42, %47 : vector<66x7xf32>
    %c0_43 = arith.constant 0 : index
    %c24 = arith.constant 24 : index
    %c0_44 = arith.constant 0 : index
    %49 = vector.load %arg1[%c0_43, %c24, %c0_44] : memref<1x96x5xf32, #tpu.memory_space<vmem>>, vector<1x66x5xf32>
    %50 = vector.shape_cast %49 : vector<1x66x5xf32> to vector<66x5xf32>
    %c8 = arith.constant 8 : index
    %c0_45 = arith.constant 0 : index
    %c0_46 = arith.constant 0 : index
    %51 = vector.load %arg2[%c8, %c0_45, %c0_46] : memref<9x5x7xf32, #tpu.memory_space<vmem>>, vector<1x5x7xf32>
    %52 = vector.shape_cast %51 : vector<1x5x7xf32> to vector<5x7xf32>
    %cst_47 = arith.constant dense<0.000000e+00> : vector<66x7xf32>
    %53 = tpu.matmul %50, %52, %cst_47 {dimension_numbers = #tpu.dot_dimension_numbers<[1], [0], [0], [1], [0, 0, 1, 1], [], []>} : vector<66x5xf32>, vector<5x7xf32>, vector<66x7xf32> -> vector<66x7xf32>
    %54 = arith.addf %48, %53 : vector<66x7xf32>
    %c0_48 = arith.constant 0 : index
    %c0_49 = arith.constant 0 : index
    %55 = vector.load %arg3[%c0_48, %c0_49] : memref<1x7xf32, #tpu.memory_space<vmem>>, vector<1x7xf32>
    %56 = vector.broadcast %55 : vector<1x7xf32> to vector<66x7xf32>
    %57 = arith.addf %54, %56 : vector<66x7xf32>
    %c0_50 = arith.constant 0 : index
    %c0_51 = arith.constant 0 : index
    %c0_52 = arith.constant 0 : index
    %58 = vector.load %arg4[%c0_50, %c0_51, %c0_52] : memref<1x66x7xf32, #tpu.memory_space<vmem>>, vector<1x66x7xf32>
    %59 = vector.shape_cast %58 : vector<1x66x7xf32> to vector<66x7xf32>
    %60 = vector.shape_cast %57 : vector<66x7xf32> to vector<1x66x7xf32>
    tpu.vector_store %arg4[%c0_50, %c0_51, %c0_52], %60 {strides = array<i32>} : memref<1x66x7xf32, #tpu.memory_space<vmem>>, vector<1x66x7xf32>,
    return
  }
  func.func @transform_0(%arg0: i32) -> (i32, i32, i32) {
    %c0_i32 = arith.constant 0 : i32
    %c0_i32_0 = arith.constant 0 : i32
    %c0_i32_1 = arith.constant 0 : i32
    return %arg0, %c0_i32, %c0_i32_0 : i32, i32, i32
  }
  func.func @transform_1(%arg0: i32) -> (i32, i32, i32) {
    %c0_i32 = arith.constant 0 : i32
    %c0_i32_0 = arith.constant 0 : i32
    %c0_i32_1 = arith.constant 0 : i32
    %c0_i32_2 = arith.constant 0 : i32
    return %c0_i32, %c0_i32_0, %c0_i32_1 : i32, i32, i32
  }
  func.func @transform_2(%arg0: i32) -> (i32, i32) {
    %c0_i32 = arith.constant 0 : i32
    %c0_i32_0 = arith.constant 0 : i32
    %c0_i32_1 = arith.constant 0 : i32
    return %c0_i32, %c0_i32_0 : i32, i32
  }
  func.func @transform_3(%arg0: i32) -> (i32, i32, i32) {
    %c0_i32 = arith.constant 0 : i32
    %c0_i32_0 = arith.constant 0 : i32
    %c0_i32_1 = arith.constant 0 : i32
    return %arg0, %c0_i32, %c0_i32_0 : i32, i32, i32
  }
}

</mosaic_0001>

<bundles_post_ra>
// kernel: tpu_custom_call.1
= control target key start
LH: loop header
LB: loop body
LE: loop exit
PB: predicated region body
PF: predicated region fallthrough
CT: control target
= control target key end

     0   :  { %s2179_s12 = smov 0   ;;  %s2627_s0 = inlined_call_operand.vmem [shape: f32[2,96,5], index: 0, kind: input, shape index: {}]   ;;  %s2628_s1 = inlined_call_operand.vmem [shape: f32[9,5,7], index: 1, kind: input, shape index: {}]   ;;  %s2629_s2 = inlined_call_operand.vmem [shape: f32[1,7], index: 2, kind: input, shape index: {}]   ;;  %s2630_s3 = inlined_call_operand.vmem [shape: f32[2,66,7], index: 3, kind: output, shape index: {}]  }
   0x1 LB: > { %s1676_s13 = sadd.s32 4294967295, %s2155_s12   ;;  %p1680_p0 = scmp.ge.s32.totalorder %s2155_s12, 1  ;;  %s2155_s12 = sphi %s2179_s12, %s13_s12  }
   0x2   : > { %p137_p1 = scmp.lt.s32.totalorder %s2155_s12, 3 }
   0x4   : > { %p138_p2 = pnand %p1680_p0, %p137_p1 }
   0x5   : > { %v1683_v0 = vld [vmem:[%s2628_s1 + $0x8] sm:$0x1f] (!%p138_p2)  ;;  %vm220_vm0 = vcmask (!%p138_p2), 1044480   ;;  %p161_p3 = scmp.lt.s32.totalorder (!%p138_p2), %s1676_s13, 1  ;;  %v2157_v1 = vmov (!%p138_p2), 0.0   ;;  %vm2158_vm1 = vmmov (!%p138_p2), 0  }
   0x6   : > { %141 = sbr.rel (%p138_p2) target bundleno = 395 (0x18b), region = 32  ;;  %1874 = vmatprep.subr.mxu0 (!%p138_p2), %v2157_v1  ;;  %2135 = vmatprep.subr.mxu1 (!%p138_p2), %v2157_v1  ;;  %vm192_vm2 = vcmask (!%p138_p2), 39936   ;;  %v1704_v2 = vld [vmem:[%s2628_s1 + $0x10] sm:$0x1f] (!%p138_p2)  ;;  %v180_v3 = vld [vmem:[%s2628_s1] sm:$0x1f] (!%p138_p2) }
   0x7   : > { %1875 = vmatpush3.msk.msra.mxu0 (!%p138_p2), %vm220_vm0, %v1683_v0  ;;  %2136 = vmatpush3.msk.msra.mxu1 (!%p138_p2), %vm220_vm0, %v1683_v0  ;;  %v1715_v14 = vld [vmem:[%s2628_s1 + $0x18] sm:$0x1f] (!%p138_p2)  ;;  %v1726_v17 = vld [vmem:[%s2628_s1 + $0x20] sm:$0x1f] (!%p138_p2)  ;;  %v1737_v34 = vld [vmem:[%s2628_s1 + $0x28] sm:$0x1f] (!%p138_p2) }
   0x8   : > { %1876 = vmatprep.mubr.msk.f32.mxu0 (!%p138_p2), %vm2158_vm1, %v2157_v1  ;;  %1891 = vmatprep.mubr.msk.f32.mxu1 (!%p138_p2), %vm2158_vm1, %v2157_v1  ;;  %v1748_v37 = vld [vmem:[%s2628_s1 + $0x30] sm:$0x1f] (!%p138_p2)  ;;  %v1759_v54 = vld [vmem:[%s2628_s1 + $0x38] sm:$0x1f] (!%p138_p2)  ;;  %v1770_v57 = vld [vmem:[%s2628_s1 + $0x40] sm:$0x1f] (!%p138_p2) }
   0x9   : > { %1932 = vmatprep.subr.mxu0 (!%p138_p2), %v2157_v1  ;;  %1903 = vmatprep.subr.mxu1 (!%p138_p2), %v2157_v1  ;;  %vm1610_vm3 = vcmask (!%p138_p2), 56320   ;;  %vm1619_vm4 = vcmask (!%p138_p2), 50176  }
   0xd   : > { %s2632_s13 = smov (!%p161_p3, %s1676_s13), 1 }
   0xe   : > { %s2137_s16 = smul.u32 96, %s2632_s13 }
   0xf   : > { %s2138_s9 = smul.u32 72, %s2632_s13 }
  0x10   : > { %s2206_s19 = scalar_lea.vmem %s2627_s0, %s2137_s16 }
  0x11   : > { %v181_v4 = vld [vmem:[%s2206_s19 + $0x1] sm:$0xff]  ;;  %v186_v5 = vld [vmem:[%s2206_s19 + $0x29] sm:$0xff]  ;;  %v187_v7 = vld [vmem:[%s2206_s19 + $0x31] sm:$0xff]  ;;  %s2594_s16 = scalar_lea.vmem %s2630_s3, %s2138_s9 }
  0x12   : > { %1877 = vmatmul.mubr.msk.f32.vlgmr.msra.gmra.mrb[0].mxu0 %vm192_vm2, %v181_v4  ;;  %1892 = vmatmul.mubr.msk.f32.vlgmr.msra.gmra.mrb[0].mxu1 %vm192_vm2, %v186_v5  ;;  %v182_v6 = vld [vmem:[%s2206_s19 + $0x9] sm:$0xff]  ;;  %v183_v8 = vld [vmem:[%s2206_s19 + $0x11] sm:$0xff]  ;;  %v188_v9 = vld [vmem:[%s2206_s19 + $0x39] sm:$0xff] }
  0x13   : > { %1933 = vmatpush3.msk.msra.mxu0 %vm220_vm0, %v1704_v2  ;;  %1904 = vmatpush3.msk.msra.mxu1 %vm220_vm0, %v180_v3  ;;  %v184_v10 = vld [vmem:[%s2206_s19 + $0x19] sm:$0xff]  ;;  %v189_v11 = vld [vmem:[%s2206_s19 + $0x41] sm:$0x3]  ;;  %v172_v15 = vld [vmem:[%s2206_s19 + $0x8] sm:$0xff] }
  0x14   : > { %1879 = vmatprep.mubr.msk.f32.mxu0 %vm2158_vm1, %v2157_v1  ;;  %1894 = vmatprep.mubr.msk.f32.mxu1 %vm2158_vm1, %v2157_v1  ;;  %v185_v12 = vld [vmem:[%s2206_s19 + $0x21] sm:$0xff]  ;;  %v173_v18 = vld [vmem:[%s2206_s19 + $0x10] sm:$0xff]  ;;  %v2285_v20 = vld [vmem:[%s2206_s19 + $0x18] sm:$0xff] }
  0x15   : > { %1961 = vmatprep.subr.mxu1 %v2157_v1  ;;  %1990 = vmatprep.subr.mxu0 %v2157_v1  ;;  %v171_v13 = vld [vmem:[%s2206_s19] sm:$0xff]  ;;  %v475_v19 = vld [vmem:[%s2206_s19 + $0xa] sm:$0xff]  ;;  %v476_v21 = vld [vmem:[%s2206_s19 + $0x12] sm:$0xff] }
  0x16   : > { %1880 = vmatmul.mubr.msk.f32.gmra.mrb[2].mxu0 %vm192_vm2, %v182_v6  ;;  %1895 = vmatmul.mubr.msk.f32.gmra.mrb[2].mxu1 %vm192_vm2, %v187_v7  ;;  %v474_v16 = vld [vmem:[%s2206_s19 + $0x2] sm:$0xff]  ;;  %v477_v23 = vld [vmem:[%s2206_s19 + $0x1a] sm:$0xff]  ;;  %v2318_v26 = vld [vmem:[%s2206_s19 + $0x30] sm:$0xff] }
  0x17   : > { %1882 = vmatprep.mubr.msk.f32.mxu0 %vm2158_vm1, %v2157_v1  ;;  %1897 = vmatprep.mubr.msk.f32.mxu1 %vm2158_vm1, %v2157_v1  ;;  %v2296_v22 = vld [vmem:[%s2206_s19 + $0x20] sm:$0xff]  ;;  %v2307_v24 = vld [vmem:[%s2206_s19 + $0x28] sm:$0xff]  ;;  %v2329_v28 = vld [vmem:[%s2206_s19 + $0x38] sm:$0xff] }
  0x18   : > { %v478_v25 = vld [vmem:[%s2206_s19 + $0x22] sm:$0xff]  ;;  %v479_v27 = vld [vmem:[%s2206_s19 + $0x2a] sm:$0xff]  ;;  %v480_v29 = vld [vmem:[%s2206_s19 + $0x32] sm:$0xff] }
  0x19   : > { %v179_v30 = vld [vmem:[%s2206_s19 + $0x40] sm:$0x3]  ;;  %v482_v32 = vld [vmem:[%s2206_s19 + $0x42] sm:$0x3]  ;;  %v634_v33 = vld [vmem:[%s2206_s19 + $0xb] sm:$0xff] }
  0x1a   : > { %1883 = vmatmul.mubr.msk.f32.gmra.mrb[4].mxu0 %vm192_vm2, %v183_v8  ;;  %1898 = vmatmul.mubr.msk.f32.gmra.mrb[4].mxu1 %vm192_vm2, %v188_v9  ;;  %v481_v31 = vld [vmem:[%s2206_s19 + $0x3a] sm:$0xff]  ;;  %v794_v36 = vld [vmem:[%s2206_s19 + $0xc] sm:$0xff]  ;;  %v637_v40 = vld [vmem:[%s2206_s19 + $0x23] sm:$0xff] }
  0x1b   : > { %1885 = vmatprep.mubr.msk.f32.mxu0 %vm2158_vm1, %v2157_v1  ;;  %1900 = vmatprep.mubr.msk.f32.mxu1 %vm2158_vm1, %v2157_v1  ;;  %v635_v35 = vld [vmem:[%s2206_s19 + $0x13] sm:$0xff]  ;;  %v636_v38 = vld [vmem:[%s2206_s19 + $0x1b] sm:$0xff]  ;;  %v638_v42 = vld [vmem:[%s2206_s19 + $0x2b] sm:$0xff] }
  0x1c   : > { %v795_v39 = vld [vmem:[%s2206_s19 + $0x14] sm:$0xff]  ;;  %v796_v41 = vld [vmem:[%s2206_s19 + $0x1c] sm:$0xff]  ;;  %v797_v43 = vld [vmem:[%s2206_s19 + $0x24] sm:$0xff] }
  0x1d   : > { %v639_v44 = vld [vmem:[%s2206_s19 + $0x33] sm:$0xff]  ;;  %v640_v46 = vld [vmem:[%s2206_s19 + $0x3b] sm:$0xff]  ;;  %v641_v48 = vld [vmem:[%s2206_s19 + $0x43] sm:$0xff] }
  0x1e   : > { %1886 = vmatmul.mubr.msk.f32.gmra.mrb[6].mxu0 %vm192_vm2, %v184_v10  ;;  %1901 = vmatmul.mubr.msk.f32.gmra.mrb[6].mxu1 %vm192_vm2, %v189_v11  ;;  %v798_v45 = vld [vmem:[%s2206_s19 + $0x2c] sm:$0xff]  ;;  %v799_v47 = vld [vmem:[%s2206_s19 + $0x34] sm:$0xff]  ;;  %v800_v49 = vld [vmem:[%s2206_s19 + $0x3c] sm:$0xff] }
  0x1f   : > { %1888 = vmatprep.mubr.msk.f32.mxu0 %vm2158_vm1, %v2157_v1  ;;  %1905 = vmatprep.mubr.msk.f32.mxu1 %vm2158_vm1, %v2157_v1  ;;  %v642_v50 = vld [vmem:[%s2206_s19 + $0x4b] sm:$0x3]  ;;  %v954_v53 = vld [vmem:[%s2206_s19 + $0xd] sm:$0xff]  ;;  %v955_v55 = vld [vmem:[%s2206_s19 + $0x15] sm:$0xff] }
  0x20   : > { %v801_v51 = vld [vmem:[%s2206_s19 + $0x44] sm:$0xff]  ;;  %v802_v52 = vld [vmem:[%s2206_s19 + $0x4c] sm:$0x3]  ;;  %v1114_v56 = vld [vmem:[%s2206_s19 + $0x16] sm:$0xff] }
  0x21   : > { %v956_v58 = vld [vmem:[%s2206_s19 + $0x1d] sm:$0xff]  ;;  %v957_v60 = vld [vmem:[%s2206_s19 + $0x25] sm:$0xff]  ;;  %v958_v62 = vld [vmem:[%s2206_s19 + $0x2d] sm:$0xff] }
  0x22   : > { %1889 = vmatmul.mubr.msk.f32.gmra.mrb[8].mxu0 %vm192_vm2, %v185_v12  ;;  %1906 = vmatmul.mubr.msk.f32.vlgmr.msra.gmra.mrb[8].mxu1 %vm192_vm2, %v171_v13  ;;  %v1115_v59 = vld [vmem:[%s2206_s19 + $0x1e] sm:$0xff]  ;;  %v1116_v61 = vld [vmem:[%s2206_s19 + $0x26] sm:$0xff]  ;;  %v1117_v63 = vld [vmem:[%s2206_s19 + $0x2e] sm:$0xff] }
  0x23   : > { %1962 = vmatpush3.msk.msra.mxu1 %vm220_vm0, %v1715_v14  ;;  %1908 = vmatprep.mubr.msk.f32.mxu1 %vm2158_vm1, %v2157_v1  ;;  %v959_v0 = vld [vmem:[%s2206_s19 + $0x35] sm:$0xff]  ;;  %v960_v3 = vld [vmem:[%s2206_s19 + $0x3d] sm:$0xff]  ;;  %v961_v5 = vld [vmem:[%s2206_s19 + $0x45] sm:$0xff] }
  0x24   : > { %1934 = vmatprep.mubr.msk.f32.mxu0 %vm2158_vm1, %v2157_v1  ;;  %2019 = vmatprep.subr.mxu1 %v2157_v1  ;;  %v1118_v2 = vld [vmem:[%s2206_s19 + $0x36] sm:$0xff]  ;;  %v1119_v4 = vld [vmem:[%s2206_s19 + $0x3e] sm:$0xff]  ;;  %v1120_v6 = vld [vmem:[%s2206_s19 + $0x46] sm:$0xff] }
  0x25   : > { %v962_v7 = vld [vmem:[%s2206_s19 + $0x4d] sm:$0x3]  ;;  %v1122_v9 = vld [vmem:[%s2206_s19 + $0x56] sm:$0x3]  ;;  %v1275_v11 = vld [vmem:[%s2206_s19 + $0x1f] sm:$0xff] }
  0x26   : > { %1909 = vmatmul.mubr.msk.f32.gmra.mrb[10].mxu1 %vm192_vm2, %v172_v15  ;;  %1935 = vmatmul.mubr.msk.f32.vlgmr.msra.gmra.mrb[10].mxu0 %vm192_vm2, %v474_v16  ;;  %v1121_v8 = vld [vmem:[%s2206_s19 + $0x4e] sm:$0xff]  ;;  %v1274_v10 = vld [vmem:[%s2206_s19 + $0x17] sm:$0xff]  ;;  %v1279_v15 = vld [vmem:[%s2206_s19 + $0x3f] sm:$0xff] }
  0x27   : > { %1991 = vmatpush3.msk.msra.mxu0 %vm220_vm0, %v1726_v17  ;;  %1911 = vmatprep.mubr.msk.f32.mxu1 %vm2158_vm1, %v2157_v1  ;;  %v1276_v12 = vld [vmem:[%s2206_s19 + $0x27] sm:$0xff]  ;;  %v1277_v13 = vld [vmem:[%s2206_s19 + $0x2f] sm:$0xff]  ;;  %v1278_v14 = vld [vmem:[%s2206_s19 + $0x37] sm:$0xff] }
  0x28   : > { %1937 = vmatprep.mubr.msk.f32.mxu0 %vm2158_vm1, %v2157_v1  ;;  %2048 = vmatprep.subr.mxu0 %v2157_v1  ;;  %v1280_v16 = vld [vmem:[%s2206_s19 + $0x47] sm:$0xff] }
  0x29   : > { %v1439_v17 = vld [vmem:[%s2206_s19 + $0x40] sm:$0xff] }
  0x2a   : > { %1912 = vmatmul.mubr.msk.f32.gmra.mrb[12].mxu1 %vm192_vm2, %v173_v18  ;;  %1938 = vmatmul.mubr.msk.f32.gmra.mrb[12].mxu0 %vm192_vm2, %v475_v19  ;;  %v1281_v18 = vld [vmem:[%s2206_s19 + $0x4f] sm:$0xff] }
  0x2b   : > { %1914 = vmatprep.mubr.msk.f32.mxu1 %vm2158_vm1, %v2157_v1  ;;  %1940 = vmatprep.mubr.msk.f32.mxu0 %vm2158_vm1, %v2157_v1  ;;  %v1440_v19 = vld [vmem:[%s2206_s19 + $0x48] sm:$0xff] }
  0x2e   : > { %1915 = vmatmul.mubr.msk.f32.gmra.mrb[14].mxu1 %vm192_vm2, %v2285_v20  ;;  %1941 = vmatmul.mubr.msk.f32.gmra.mrb[14].mxu0 %vm192_vm2, %v476_v21  ;;  %v1441_v21 = vld [vmem:[%s2206_s19 + $0x50] sm:$0xff] }
  0x2f   : > { %1917 = vmatprep.mubr.msk.f32.mxu1 %vm2158_vm1, %v2157_v1  ;;  %1943 = vmatprep.mubr.msk.f32.mxu0 %vm2158_vm1, %v2157_v1 }
  0x32   : > { %1918 = vmatmul.mubr.msk.f32.gmra.mrb[16].mxu1 %vm192_vm2, %v2296_v22  ;;  %1944 = vmatmul.mubr.msk.f32.gmra.mrb[16].mxu0 %vm192_vm2, %v477_v23 }
  0x33   : > { %1920 = vmatprep.mubr.msk.f32.mxu1 %vm2158_vm1, %v2157_v1  ;;  %1946 = vmatprep.mubr.msk.f32.mxu0 %vm2158_vm1, %v2157_v1 }
  0x36   : > { %1921 = vmatmul.mubr.msk.f32.gmra.mrb[18].mxu1 %vm192_vm2, %v2307_v24  ;;  %1947 = vmatmul.mubr.msk.f32.gmra.mrb[18].mxu0 %vm192_vm2, %v478_v25 }
  0x37   : > { %1923 = vmatprep.mubr.msk.f32.mxu1 %vm2158_vm1, %v2157_v1  ;;  %1949 = vmatprep.mubr.msk.f32.mxu0 %vm2158_vm1, %v2157_v1 }
  0x3a   : > { %1924 = vmatmul.mubr.msk.f32.gmra.mrb[20].mxu1 %vm192_vm2, %v2318_v26  ;;  %1950 = vmatmul.mubr.msk.f32.gmra.mrb[20].mxu0 %vm192_vm2, %v479_v27 }
  0x3b   : > { %1926 = vmatprep.mubr.msk.f32.mxu1 %vm2158_vm1, %v2157_v1  ;;  %1952 = vmatprep.mubr.msk.f32.mxu0 %vm2158_vm1, %v2157_v1 }
  0x3e   : > { %1927 = vmatmul.mubr.msk.f32.gmra.mrb[22].mxu1 %vm192_vm2, %v2329_v28  ;;  %1953 = vmatmul.mubr.msk.f32.gmra.mrb[22].mxu0 %vm192_vm2, %v480_v29 }
  0x3f   : > { %1929 = vmatprep.mubr.msk.f32.mxu1 %vm2158_vm1, %v2157_v1  ;;  %1955 = vmatprep.mubr.msk.f32.mxu0 %vm2158_vm1, %v2157_v1 }
  0x42   : > { %1930 = vmatmul.mubr.msk.f32.gmra.mrb[24].mxu1 %vm192_vm2, %v179_v30  ;;  %1956 = vmatmul.mubr.msk.f32.gmra.mrb[24].mxu0 %vm192_vm2, %v481_v31 }
  0x43   : > { %1958 = vmatprep.mubr.msk.f32.mxu0 %vm2158_vm1, %v2157_v1  ;;  %1963 = vmatprep.mubr.msk.f32.mxu1 %vm2158_vm1, %v2157_v1 }
  0x46   : > { %1959 = vmatmul.mubr.msk.f32.gmra.mrb[26].mxu0 %vm192_vm2, %v482_v32  ;;  %1964 = vmatmul.mubr.msk.f32.vlgmr.msra.gmra.mrb[26].mxu1 %vm192_vm2, %v634_v33 }
  0x47   : > { %2020 = vmatpush3.msk.msra.mxu1 %vm220_vm0, %v1737_v34  ;;  %1966 = vmatprep.mubr.msk.f32.mxu1 %vm2158_vm1, %v2157_v1 }
  0x48   : > { %1992 = vmatprep.mubr.msk.f32.mxu0 %vm2158_vm1, %v2157_v1  ;;  %2077 = vmatprep.subr.mxu1 %v2157_v1 }
  0x4a   : > { %1967 = vmatmul.mubr.msk.f32.gmra.mrb[28].mxu1 %vm192_vm2, %v635_v35  ;;  %1993 = vmatmul.mubr.msk.f32.vlgmr.msra.gmra.mrb[28].mxu0 %vm192_vm2, %v794_v36 }
  0x4b   : > { %2049 = vmatpush3.msk.msra.mxu0 %vm220_vm0, %v1748_v37  ;;  %1969 = vmatprep.mubr.msk.f32.mxu1 %vm2158_vm1, %v2157_v1 }
  0x4c   : > { %1995 = vmatprep.mubr.msk.f32.mxu0 %vm2158_vm1, %v2157_v1  ;;  %2106 = vmatprep.subr.mxu0 %v2157_v1 }
  0x4e   : > { %1970 = vmatmul.mubr.msk.f32.gmra.mrb[30].mxu1 %vm192_vm2, %v636_v38  ;;  %1996 = vmatmul.mubr.msk.f32.gmra.mrb[30].mxu0 %vm192_vm2, %v795_v39 }
  0x4f   : > { %1972 = vmatprep.mubr.msk.f32.mxu1 %vm2158_vm1, %v2157_v1  ;;  %1998 = vmatprep.mubr.msk.f32.mxu0 %vm2158_vm1, %v2157_v1 }
  0x52   : > { %1973 = vmatmul.mubr.msk.f32.gmra.mrb[32].mxu1 %vm192_vm2, %v637_v40  ;;  %1999 = vmatmul.mubr.msk.f32.gmra.mrb[32].mxu0 %vm192_vm2, %v796_v41 }
  0x53   : > { %1975 = vmatprep.mubr.msk.f32.mxu1 %vm2158_vm1, %v2157_v1  ;;  %2001 = vmatprep.mubr.msk.f32.mxu0 %vm2158_vm1, %v2157_v1 }
  0x56   : > { %1976 = vmatmul.mubr.msk.f32.gmra.mrb[34].mxu1 %vm192_vm2, %v638_v42  ;;  %2002 = vmatmul.mubr.msk.f32.gmra.mrb[34].mxu0 %vm192_vm2, %v797_v43 }
  0x57   : > { %1978 = vmatprep.mubr.msk.f32.mxu1 %vm2158_vm1, %v2157_v1  ;;  %2004 = vmatprep.mubr.msk.f32.mxu0 %vm2158_vm1, %v2157_v1 }
  0x5a   : > { %1979 = vmatmul.mubr.msk.f32.gmra.mrb[36].mxu1 %vm192_vm2, %v639_v44  ;;  %2005 = vmatmul.mubr.msk.f32.gmra.mrb[36].mxu0 %vm192_vm2, %v798_v45 }
  0x5b   : > { %1981 = vmatprep.mubr.msk.f32.mxu1 %vm2158_vm1, %v2157_v1  ;;  %2007 = vmatprep.mubr.msk.f32.mxu0 %vm2158_vm1, %v2157_v1 }
  0x5e   : > { %1982 = vmatmul.mubr.msk.f32.gmra.mrb[38].mxu1 %vm192_vm2, %v640_v46  ;;  %2008 = vmatmul.mubr.msk.f32.gmra.mrb[38].mxu0 %vm192_vm2, %v799_v47 }
  0x5f   : > { %1984 = vmatprep.mubr.msk.f32.mxu1 %vm2158_vm1, %v2157_v1  ;;  %2010 = vmatprep.mubr.msk.f32.mxu0 %vm2158_vm1, %v2157_v1 }
  0x62   : > { %1985 = vmatmul.mubr.msk.f32.gmra.mrb[40].mxu1 %vm192_vm2, %v641_v48  ;;  %2011 = vmatmul.mubr.msk.f32.gmra.mrb[40].mxu0 %vm192_vm2, %v800_v49 }
  0x63   : > { %1987 = vmatprep.mubr.msk.f32.mxu1 %vm2158_vm1, %v2157_v1  ;;  %2013 = vmatprep.mubr.msk.f32.mxu0 %vm2158_vm1, %v2157_v1 }
  0x66   : > { %1988 = vmatmul.mubr.msk.f32.gmra.mrb[42].mxu1 %vm192_vm2, %v642_v50  ;;  %2014 = vmatmul.mubr.msk.f32.gmra.mrb[42].mxu0 %vm192_vm2, %v801_v51 }
  0x67   : > { %2016 = vmatprep.mubr.msk.f32.mxu0 %vm2158_vm1, %v2157_v1  ;;  %2021 = vmatprep.mubr.msk.f32.mxu1 %vm2158_vm1, %v2157_v1 }
  0x6a   : > { %2017 = vmatmul.mubr.msk.f32.gmra.mrb[44].mxu0 %vm192_vm2, %v802_v52  ;;  %2022 = vmatmul.mubr.msk.f32.vlgmr.msra.gmra.mrb[44].mxu1 %vm192_vm2, %v954_v53 }
  0x6b   : > { %2078 = vmatpush3.msk.msra.mxu1 %vm220_vm0, %v1759_v54  ;;  %2024 = vmatprep.mubr.msk.f32.mxu1 %vm2158_vm1, %v2157_v1 }
  0x6c   : > { %2050 = vmatprep.mubr.msk.f32.mxu0 %vm2158_vm1, %v2157_v1 }
  0x6e   : > { %2025 = vmatmul.mubr.msk.f32.gmra.mrb[46].mxu1 %vm192_vm2, %v955_v55  ;;  %2051 = vmatmul.mubr.msk.f32.vlgmr.msra.gmra.mrb[46].mxu0 %vm192_vm2, %v1114_v56 }
  0x6f   : > { %2107 = vmatpush3.msk.msra.mxu0 %vm220_vm0, %v1770_v57  ;;  %2027 = vmatprep.mubr.msk.f32.mxu1 %vm2158_vm1, %v2157_v1 }
  0x70   : > { %2053 = vmatprep.mubr.msk.f32.mxu0 %vm2158_vm1, %v2157_v1 }
  0x72   : > { %2028 = vmatmul.mubr.msk.f32.gmra.mrb[48].mxu1 %vm192_vm2, %v956_v58  ;;  %2054 = vmatmul.mubr.msk.f32.gmra.mrb[48].mxu0 %vm192_vm2, %v1115_v59 }
  0x73   : > { %2030 = vmatprep.mubr.msk.f32.mxu1 %vm2158_vm1, %v2157_v1  ;;  %2056 = vmatprep.mubr.msk.f32.mxu0 %vm2158_vm1, %v2157_v1 }
  0x76   : > { %2031 = vmatmul.mubr.msk.f32.gmra.mrb[50].mxu1 %vm192_vm2, %v957_v60  ;;  %2057 = vmatmul.mubr.msk.f32.gmra.mrb[50].mxu0 %vm192_vm2, %v1116_v61 }
  0x77   : > { %2033 = vmatprep.mubr.msk.f32.mxu1 %vm2158_vm1, %v2157_v1  ;;  %2059 = vmatprep.mubr.msk.f32.mxu0 %vm2158_vm1, %v2157_v1 }
  0x7a   : > { %2034 = vmatmul.mubr.msk.f32.gmra.mrb[52].mxu1 %vm192_vm2, %v958_v62  ;;  %2060 = vmatmul.mubr.msk.f32.gmra.mrb[52].mxu0 %vm192_vm2, %v1117_v63 }
  0x7b   : > { %2036 = vmatprep.mubr.msk.f32.mxu1 %vm2158_vm1, %v2157_v1  ;;  %2062 = vmatprep.mubr.msk.f32.mxu0 %vm2158_vm1, %v2157_v1 }
  0x7e   : > { %2037 = vmatmul.mubr.msk.f32.gmra.mrb[54].mxu1 %vm192_vm2, %v959_v0  ;;  %2063 = vmatmul.mubr.msk.f32.gmra.mrb[54].mxu0 %vm192_vm2, %v1118_v2 }
  0x7f   : > { %2039 = vmatprep.mubr.msk.f32.mxu1 %vm2158_vm1, %v2157_v1  ;;  %2065 = vmatprep.mubr.msk.f32.mxu0 %vm2158_vm1, %v2157_v1 }
  0x82   : > { %2040 = vmatmul.mubr.msk.f32.gmra.mrb[56].mxu1 %vm192_vm2, %v960_v3  ;;  %2066 = vmatmul.mubr.msk.f32.gmra.mrb[56].mxu0 %vm192_vm2, %v1119_v4 }
  0x83   : > { %2042 = vmatprep.mubr.msk.f32.mxu1 %vm2158_vm1, %v2157_v1  ;;  %2068 = vmatprep.mubr.msk.f32.mxu0 %vm2158_vm1, %v2157_v1 }
  0x86   : > { %2043 = vmatmul.mubr.msk.f32.gmra.mrb[58].mxu1 %vm192_vm2, %v961_v5  ;;  %2069 = vmatmul.mubr.msk.f32.gmra.mrb[58].mxu0 %vm192_vm2, %v1120_v6 }
  0x87   : > { %2045 = vmatprep.mubr.msk.f32.mxu1 %vm2158_vm1, %v2157_v1  ;;  %2071 = vmatprep.mubr.msk.f32.mxu0 %vm2158_vm1, %v2157_v1 }
  0x8a   : > { %2046 = vmatmul.mubr.msk.f32.gmra.mrb[60].mxu1 %vm192_vm2, %v962_v7  ;;  %2072 = vmatmul.mubr.msk.f32.gmra.mrb[60].mxu0 %vm192_vm2, %v1121_v8 }
  0x8b   : > { %2074 = vmatprep.mubr.msk.f32.mxu0 %vm2158_vm1, %v2157_v1  ;;  %2079 = vmatprep.mubr.msk.f32.mxu1 %vm2158_vm1, %v2157_v1 }
  0x8e   : > { %2075 = vmatmul.mubr.msk.f32.gmra.mrb[62].mxu0 %vm192_vm2, %v1122_v9  ;;  %2080 = vmatmul.mubr.msk.f32.vlgmr.msra.gmra.mrb[62].mxu1 %vm192_vm2, %v1274_v10 }
  0x8f   : > { %2082 = vmatprep.mubr.msk.f32.mxu1 %vm2158_vm1, %v2157_v1  ;;  %2108 = vmatprep.mubr.msk.f32.mxu0 %vm2158_vm1, %v2157_v1 }
  0x92   : > { %2083 = vmatmul.mubr.msk.f32.gmra.mrb[64].mxu1 %vm192_vm2, %v1275_v11  ;;  %2109 = vmatmul.mubr.msk.f32.vlgmr.msra.gmra.mrb[64].mxu0 %vm192_vm2, %v2285_v20  ;;  %v1282_v20 = vld [vmem:[%s2206_s19 + $0x57] sm:$0x3] }
  0x93   : > { %2085 = vmatprep.mubr.msk.f32.mxu1 %vm2158_vm1, %v2157_v1  ;;  %2111 = vmatprep.mubr.msk.f32.mxu0 %vm2158_vm1, %v2157_v1 }
  0x96   : > { %2086 = vmatmul.mubr.msk.f32.gmra.mrb[66].mxu1 %vm192_vm2, %v1276_v12  ;;  %2112 = vmatmul.mubr.msk.f32.gmra.mrb[66].mxu0 %vm192_vm2, %v2296_v22  ;;  %v1442_v22 = vld [vmem:[%s2206_s19 + $0x58] sm:$0x3] }
  0x97   : > { %2088 = vmatprep.mubr.msk.f32.mxu1 %vm2158_vm1, %v2157_v1  ;;  %2114 = vmatprep.mubr.msk.f32.mxu0 %vm2158_vm1, %v2157_v1 }
  0x9a   : > { %2089 = vmatmul.mubr.msk.f32.gmra.mrb[68].mxu1 %vm192_vm2, %v1277_v13  ;;  %2115 = vmatmul.mubr.msk.f32.gmra.mrb[68].mxu0 %vm192_vm2, %v2307_v24 }
  0x9b   : > { %2091 = vmatprep.mubr.msk.f32.mxu1 %vm2158_vm1, %v2157_v1  ;;  %2117 = vmatprep.mubr.msk.f32.mxu0 %vm2158_vm1, %v2157_v1 }
  0x9e   : > { %2092 = vmatmul.mubr.msk.f32.gmra.mrb[70].mxu1 %vm192_vm2, %v1278_v14  ;;  %2118 = vmatmul.mubr.msk.f32.gmra.mrb[70].mxu0 %vm192_vm2, %v2318_v26 }
  0x9f   : > { %2094 = vmatprep.mubr.msk.f32.mxu1 %vm2158_vm1, %v2157_v1  ;;  %2120 = vmatprep.mubr.msk.f32.mxu0 %vm2158_vm1, %v2157_v1 }
  0xa2   : > { %2095 = vmatmul.mubr.msk.f32.gmra.mrb[72].mxu1 %vm192_vm2, %v1279_v15  ;;  %2121 = vmatmul.mubr.msk.f32.gmra.mrb[72].mxu0 %vm192_vm2, %v2329_v28 }
  0xa3   : > { %2097 = vmatprep.mubr.msk.f32.mxu1 %vm2158_vm1, %v2157_v1  ;;  %2123 = vmatprep.mubr.msk.f32.mxu0 %vm2158_vm1, %v2157_v1 }
  0xa6   : > { %2098 = vmatmul.mubr.msk.f32.gmra.mrb[74].mxu1 %vm192_vm2, %v1280_v16  ;;  %2124 = vmatmul.mubr.msk.f32.gmra.mrb[74].mxu0 %vm192_vm2, %v1439_v17 }
  0xa7   : > { %2100 = vmatprep.mubr.msk.f32.mxu1 %vm2158_vm1, %v2157_v1  ;;  %2126 = vmatprep.mubr.msk.f32.mxu0 %vm2158_vm1, %v2157_v1 }
  0xaa   : > { %2101 = vmatmul.mubr.msk.f32.gmra.mrb[76].mxu1 %vm192_vm2, %v1281_v18  ;;  %2127 = vmatmul.mubr.msk.f32.gmra.mrb[76].mxu0 %vm192_vm2, %v1440_v19 }
  0xab   : > { %2103 = vmatprep.mubr.msk.f32.mxu1 %vm2158_vm1, %v2157_v1  ;;  %2129 = vmatprep.mubr.msk.f32.mxu0 %vm2158_vm1, %v2157_v1 }
  0xae   : > { %2104 = vmatmul.mubr.msk.f32.gmra.mrb[78].mxu1 %vm192_vm2, %v1282_v20  ;;  %2130 = vmatmul.mubr.msk.f32.gmra.mrb[78].mxu0 %vm192_vm2, %v1441_v21 }
  0xaf   : > { %2132 = vmatprep.mubr.msk.f32.mxu0 %vm2158_vm1, %v2157_v1 }
  0xb2   : > { %2133 = vmatmul.mubr.msk.f32.gmra.mrb[80].mxu0 %vm192_vm2, %v1442_v22 }
  0xe5   : > { %v290_v23 = vpop.f32.mrb[0].mxu0  ;;  %v315_v24 = vpop.f32.mrb[0].mxu1 }
  0xe6   : > { %v1878_v25 = vpop.f32.mrb[1].mxu0  ;;  %v1893_v26 = vpop.f32.mrb[1].mxu1 }
  0xe9   : > { %v295_v27 = vpop.f32.mrb[2].mxu0  ;;  %v320_v28 = vpop.f32.mrb[2].mxu1 }
  0xea   : > { %v1881_v29 = vpop.f32.mrb[3].mxu0  ;;  %v1896_v30 = vpop.f32.mrb[3].mxu1 }
  0xed   : > { %v300_v31 = vpop.f32.mrb[4].mxu0  ;;  %v325_v32 = vpop.f32.mrb[4].mxu1 }
  0xee   : > { %v1884_v33 = vpop.f32.mrb[5].mxu0  ;;  %v1899_v34 = vpop.f32.mrb[5].mxu1 }
  0xf1   : > { %v305_v35 = vpop.f32.mrb[6].mxu0  ;;  %v330_v36 = vpop.f32.mrb[6].mxu1 }
  0xf2   : > { %v1887_v37 = vpop.f32.mrb[7].mxu0  ;;  %v1902_v38 = vpop.f32.mrb[7].mxu1 }
  0xf5   : > { %v310_v1 = vpop.f32.mrb[8].mxu0  ;;  %v430_v39 = vpop.f32.mrb[8].mxu1 }
  0xf6   : > { %v431_v40 = vadd.f32 %v430_v39, %v290_v23  ;;  %v1890_v41 = vpop.f32.mrb[9].mxu0  ;;  %v1907_v42 = vpop.f32.mrb[9].mxu1 }
  0xf9   : > { %v435_v43 = vpop.f32.mrb[10].mxu1  ;;  %v581_v44 = vpop.f32.mrb[10].mxu0 }
  0xfa   : > { %v436_v45 = vadd.f32 %v435_v43, %v295_v27  ;;  %v625_v46 = vadd.f32 %v581_v44, %v431_v40  ;;  %v1936_v47 = vpop.f32.mrb[11].mxu0  ;;  %v1910_v48 = vpop.f32.mrb[11].mxu1 }
  0xfd   : > { %v440_v49 = vpop.f32.mrb[12].mxu1  ;;  %v586_v50 = vpop.f32.mrb[12].mxu0 }
  0xfe   : > { %v441_v51 = vadd.f32 %v440_v49, %v300_v31  ;;  %v626_v52 = vadd.f32 %v586_v50, %v436_v45  ;;  %v1939_v53 = vpop.f32.mrb[13].mxu0  ;;  %v1913_v54 = vpop.f32.mrb[13].mxu1 }
 0x101   : > { %v445_v55 = vpop.f32.mrb[14].mxu1  ;;  %v591_v56 = vpop.f32.mrb[14].mxu0 }
 0x102   : > { %v446_v57 = vadd.f32 %v445_v55, %v305_v35  ;;  %v627_v58 = vadd.f32 %v591_v56, %v441_v51  ;;  %v1942_v59 = vpop.f32.mrb[15].mxu0  ;;  %v1916_v60 = vpop.f32.mrb[15].mxu1 }
 0x105   : > { %v450_v61 = vpop.f32.mrb[16].mxu1  ;;  %v596_v62 = vpop.f32.mrb[16].mxu0 }
 0x106   : > { %v451_v63 = vadd.f32 %v450_v61, %v310_v1  ;;  %v628_v0 = vadd.f32 %v596_v62, %v446_v57  ;;  %v1945_v2 = vpop.f32.mrb[17].mxu0  ;;  %v1919_v3 = vpop.f32.mrb[17].mxu1 }
 0x109   : > { %v455_v4 = vpop.f32.mrb[18].mxu1  ;;  %v601_v5 = vpop.f32.mrb[18].mxu0 }
 0x10a   : > { %v456_v6 = vadd.f32 %v455_v4, %v315_v24  ;;  %v629_v7 = vadd.f32 %v601_v5, %v451_v63  ;;  %v1948_v8 = vpop.f32.mrb[19].mxu0  ;;  %v1922_v9 = vpop.f32.mrb[19].mxu1 }
 0x10d   : > { %v460_v10 = vpop.f32.mrb[20].mxu1  ;;  %v606_v11 = vpop.f32.mrb[20].mxu0 }
 0x10e   : > { %v461_v12 = vadd.f32 %v460_v10, %v320_v28  ;;  %v630_v13 = vadd.f32 %v606_v11, %v456_v6  ;;  %v1951_v14 = vpop.f32.mrb[21].mxu0  ;;  %v1925_v15 = vpop.f32.mrb[21].mxu1 }
 0x111   : > { %v465_v16 = vpop.f32.mrb[22].mxu1  ;;  %v611_v17 = vpop.f32.mrb[22].mxu0 }
 0x112   : > { %v466_v18 = vadd.f32 %v465_v16, %v325_v32  ;;  %v631_v19 = vadd.f32 %v611_v17, %v461_v12  ;;  %v1954_v20 = vpop.f32.mrb[23].mxu0  ;;  %v1928_v21 = vpop.f32.mrb[23].mxu1 }
 0x115   : > { %v470_v22 = vpop.f32.mrb[24].mxu1  ;;  %v616_v23 = vpop.f32.mrb[24].mxu0 }
 0x116   : > { %v471_v25 = vadd.f32 %v470_v22, %v330_v36  ;;  %v632_v26 = vadd.f32 %v616_v23, %v466_v18  ;;  %v1957_v24 = vpop.f32.mrb[25].mxu0  ;;  %v1931_v27 = vpop.f32.mrb[25].mxu1 }
 0x119   : > { %v621_v29 = vpop.f32.mrb[26].mxu0  ;;  %v741_v30 = vpop.f32.mrb[26].mxu1 }
 0x11a   : > { %v633_v31 = vadd.f32 %v621_v29, %v471_v25  ;;  %v785_v33 = vadd.f32 %v741_v30, %v625_v46  ;;  %v1960_v28 = vpop.f32.mrb[27].mxu0  ;;  %v1965_v34 = vpop.f32.mrb[27].mxu1 }
 0x11d   : > { %v746_v35 = vpop.f32.mrb[28].mxu1  ;;  %v901_v37 = vpop.f32.mrb[28].mxu0 }
 0x11e   : > { %v786_v38 = vadd.f32 %v746_v35, %v626_v52  ;;  %v945_v1 = vadd.f32 %v901_v37, %v785_v33  ;;  %v1994_v32 = vpop.f32.mrb[29].mxu0  ;;  %v1968_v39 = vpop.f32.mrb[29].mxu1 }
 0x121   : > { %v751_v40 = vpop.f32.mrb[30].mxu1  ;;  %v906_v41 = vpop.f32.mrb[30].mxu0 }
 0x122   : > { %v787_v42 = vadd.f32 %v751_v40, %v627_v58  ;;  %v946_v43 = vadd.f32 %v906_v41, %v786_v38  ;;  %v1997_v36 = vpop.f32.mrb[31].mxu0  ;;  %v1971_v44 = vpop.f32.mrb[31].mxu1 }
 0x125   : > { %v756_v45 = vpop.f32.mrb[32].mxu1  ;;  %v911_v47 = vpop.f32.mrb[32].mxu0 }
 0x126   : > { %v788_v48 = vadd.f32 %v756_v45, %v628_v0  ;;  %v947_v49 = vadd.f32 %v911_v47, %v787_v42  ;;  %v2000_v50 = vpop.f32.mrb[33].mxu0  ;;  %v1974_v46 = vpop.f32.mrb[33].mxu1 }
 0x129   : > { %v761_v51 = vpop.f32.mrb[34].mxu1  ;;  %v916_v53 = vpop.f32.mrb[34].mxu0 }
 0x12a   : > { %v789_v54 = vadd.f32 %v761_v51, %v629_v7  ;;  %v948_v55 = vadd.f32 %v916_v53, %v788_v48  ;;  %v2003_v52 = vpop.f32.mrb[35].mxu0  ;;  %v1977_v56 = vpop.f32.mrb[35].mxu1 }
 0x12d   : > { %v766_v57 = vpop.f32.mrb[36].mxu1  ;;  %v921_v59 = vpop.f32.mrb[36].mxu0 }
 0x12e   : > { %v790_v60 = vadd.f32 %v766_v57, %v630_v13  ;;  %v949_v61 = vadd.f32 %v921_v59, %v789_v54  ;;  %v2006_v58 = vpop.f32.mrb[37].mxu0  ;;  %v1980_v62 = vpop.f32.mrb[37].mxu1 }
 0x131   : > { %v771_v63 = vpop.f32.mrb[38].mxu1  ;;  %v926_v2 = vpop.f32.mrb[38].mxu0 }
 0x132   : > { %v791_v3 = vadd.f32 %v771_v63, %v631_v19  ;;  %v950_v4 = vadd.f32 %v926_v2, %v790_v60  ;;  %v2009_v0 = vpop.f32.mrb[39].mxu0  ;;  %v1983_v5 = vpop.f32.mrb[39].mxu1 }
 0x135   : > { %v776_v6 = vpop.f32.mrb[40].mxu1  ;;  %v931_v8 = vpop.f32.mrb[40].mxu0 }
 0x136   : > { %v792_v9 = vadd.f32 %v776_v6, %v632_v26  ;;  %v951_v10 = vadd.f32 %v931_v8, %v791_v3  ;;  %v2012_v7 = vpop.f32.mrb[41].mxu0  ;;  %v1986_v11 = vpop.f32.mrb[41].mxu1 }
 0x139   : > { %v781_v12 = vpop.f32.mrb[42].mxu1  ;;  %v936_v14 = vpop.f32.mrb[42].mxu0 }
 0x13a   : > { %v793_v15 = vadd.f32 %v781_v12, %v633_v31  ;;  %v952_v16 = vadd.f32 %v936_v14, %v792_v9  ;;  %v2015_v13 = vpop.f32.mrb[43].mxu0  ;;  %v1989_v17 = vpop.f32.mrb[43].mxu1 }
 0x13b   : > { %v2589_v13 = vld [vmem:[%s2629_s2] ss:$0 sm:$0xff] }
 0x13d   : > { %v941_v18 = vpop.f32.mrb[44].mxu0  ;;  %v1061_v20 = vpop.f32.mrb[44].mxu1 }
 0x13e   : > { %v953_v21 = vadd.f32 %v941_v18, %v793_v15  ;;  %v1105_v22 = vadd.f32 %v1061_v20, %v945_v1  ;;  %v2018_v19 = vpop.f32.mrb[45].mxu0  ;;  %v2023_v23 = vpop.f32.mrb[45].mxu1 }
 0x141   : > { %v1066_v25 = vpop.f32.mrb[46].mxu1  ;;  %v1221_v24 = vpop.f32.mrb[46].mxu0 }
 0x142   : > { %v1106_v27 = vadd.f32 %v1066_v25, %v946_v43  ;;  %v1265_v29 = vadd.f32 %v1221_v24, %v1105_v22  ;;  %v2052_v26 = vpop.f32.mrb[47].mxu0  ;;  %v2026_v30 = vpop.f32.mrb[47].mxu1 }
 0x145   : > { %v1071_v33 = vpop.f32.mrb[48].mxu1  ;;  %v1226_v28 = vpop.f32.mrb[48].mxu0 }
 0x146   : > { %v1107_v34 = vadd.f32 %v1071_v33, %v947_v49  ;;  %v1266_v35 = vadd.f32 %v1226_v28, %v1106_v27  ;;  %v2055_v31 = vpop.f32.mrb[49].mxu0  ;;  %v2029_v37 = vpop.f32.mrb[49].mxu1 }
 0x149   : > { %v1076_v38 = vpop.f32.mrb[50].mxu1  ;;  %v1231_v32 = vpop.f32.mrb[50].mxu0 }
 0x14a   : > { %v1108_v39 = vadd.f32 %v1076_v38, %v948_v55  ;;  %v1267_v40 = vadd.f32 %v1231_v32, %v1107_v34  ;;  %v2058_v41 = vpop.f32.mrb[51].mxu0  ;;  %v2032_v1 = vpop.f32.mrb[51].mxu1 }
 0x14d   : > { %v1081_v42 = vpop.f32.mrb[52].mxu1  ;;  %v1236_v36 = vpop.f32.mrb[52].mxu0 }
 0x14e   : > { %v1109_v44 = vadd.f32 %v1081_v42, %v949_v61  ;;  %v1268_v45 = vadd.f32 %v1236_v36, %v1108_v39  ;;  %v2061_v43 = vpop.f32.mrb[53].mxu0  ;;  %v2035_v47 = vpop.f32.mrb[53].mxu1 }
 0x151   : > { %v1086_v48 = vpop.f32.mrb[54].mxu1  ;;  %v1241_v50 = vpop.f32.mrb[54].mxu0 }
 0x152   : > { %v1110_v46 = vadd.f32 %v1086_v48, %v950_v4  ;;  %v1269_v51 = vadd.f32 %v1241_v50, %v1109_v44  ;;  %v2064_v49 = vpop.f32.mrb[55].mxu0  ;;  %v2038_v53 = vpop.f32.mrb[55].mxu1 }
 0x155   : > { %v1091_v54 = vpop.f32.mrb[56].mxu1  ;;  %v1246_v52 = vpop.f32.mrb[56].mxu0 }
 0x156   : > { %v1111_v56 = vadd.f32 %v1091_v54, %v951_v10  ;;  %v1270_v57 = vadd.f32 %v1246_v52, %v1110_v46  ;;  %v2067_v55 = vpop.f32.mrb[57].mxu0  ;;  %v2041_v59 = vpop.f32.mrb[57].mxu1 }
 0x159   : > { %v1096_v60 = vpop.f32.mrb[58].mxu1  ;;  %v1251_v58 = vpop.f32.mrb[58].mxu0 }
 0x15a   : > { %v1112_v62 = vadd.f32 %v1096_v60, %v952_v16  ;;  %v1271_v61 = vadd.f32 %v1251_v58, %v1111_v56  ;;  %v2070_v63 = vpop.f32.mrb[59].mxu0  ;;  %v2044_v2 = vpop.f32.mrb[59].mxu1 }
 0x15d   : > { %v1101_v3 = vpop.f32.mrb[60].mxu1  ;;  %v1256_v0 = vpop.f32.mrb[60].mxu0 }
 0x15e   : > { %v1113_v5 = vadd.f32 %v1101_v3, %v953_v21  ;;  %v2581_v4 = vadd.f32 %v1256_v0, %v1112_v62  ;;  %v2073_v6 = vpop.f32.mrb[61].mxu0  ;;  %v2047_v8 = vpop.f32.mrb[61].mxu1 }
 0x161   : > { %v1261_v9 = vpop.f32.mrb[62].mxu0  ;;  %v1381_v7 = vpop.f32.mrb[62].mxu1 }
 0x162   : > { %v2583_v10 = vadd.f32 %v1261_v9, %v1113_v5  ;;  %v1425_v11 = vadd.f32 %v1381_v7, %v1265_v29  ;;  %v2076_v12 = vpop.f32.mrb[63].mxu0  ;;  %v2081_v14 = vpop.f32.mrb[63].mxu1 }
 0x165   : > { %v1386_v15 = vpop.f32.mrb[64].mxu1  ;;  %v1541_v16 = vpop.f32.mrb[64].mxu0 }
 0x166   : > { %v1426_v17 = vadd.f32 %v1386_v15, %v1266_v35  ;;  %v1585_v18 = vadd.f32 %v1541_v16, %v1425_v11  ;;  %v2110_v20 = vpop.f32.mrb[65].mxu0  ;;  %v2084_v21 = vpop.f32.mrb[65].mxu1 }
 0x168   : > { %v1601_v22 = vadd.f32 %v2589_v13, %v1585_v18 }
 0x169   : > { %v1391_v19 = vpop.f32.mrb[66].mxu1  ;;  %v1546_v23 = vpop.f32.mrb[66].mxu0 }
 0x16a   : > { %1611 = vst.msk [vmem:[%s2594_s16] sm:$0xff] %vm1610_vm3, %v1601_v22  ;;  %v1427_v25 = vadd.f32 %v1391_v19, %v1267_v40  ;;  %v1586_v24 = vadd.f32 %v1546_v23, %v1426_v17  ;;  %v2113_v27 = vpop.f32.mrb[67].mxu0  ;;  %v2087_v29 = vpop.f32.mrb[67].mxu1 }
 0x16c   : > { %v1602_v26 = vadd.f32 %v2589_v13, %v1586_v24 }
 0x16d   : > { %v1396_v30 = vpop.f32.mrb[68].mxu1  ;;  %v1551_v33 = vpop.f32.mrb[68].mxu0 }
 0x16e   : > { %1612 = vst.msk [vmem:[%s2594_s16 + $0x8] sm:$0xff] %vm1610_vm3, %v1602_v26  ;;  %v1428_v28 = vadd.f32 %v1396_v30, %v1268_v45  ;;  %v1587_v34 = vadd.f32 %v1551_v33, %v1427_v25  ;;  %v2116_v35 = vpop.f32.mrb[69].mxu0  ;;  %v2090_v31 = vpop.f32.mrb[69].mxu1 }
 0x170   : > { %v1603_v37 = vadd.f32 %v2589_v13, %v1587_v34 }
 0x171   : > { %v1401_v38 = vpop.f32.mrb[70].mxu1  ;;  %v1556_v32 = vpop.f32.mrb[70].mxu0 }
 0x172   : > { %1613 = vst.msk [vmem:[%s2594_s16 + $0x10] sm:$0xff] %vm1610_vm3, %v1603_v37  ;;  %v1429_v39 = vadd.f32 %v1401_v38, %v1269_v51  ;;  %v1588_v40 = vadd.f32 %v1556_v32, %v1428_v28  ;;  %v2119_v41 = vpop.f32.mrb[71].mxu0  ;;  %v2093_v1 = vpop.f32.mrb[71].mxu1 }
 0x174   : > { %v1604_v42 = vadd.f32 %v2589_v13, %v1588_v40 }
 0x175   : > { %v1406_v36 = vpop.f32.mrb[72].mxu1  ;;  %v1561_v44 = vpop.f32.mrb[72].mxu0 }
 0x176   : > { %1614 = vst.msk [vmem:[%s2594_s16 + $0x18] sm:$0xff] %vm1610_vm3, %v1604_v42  ;;  %v1430_v45 = vadd.f32 %v1406_v36, %v1270_v57  ;;  %v1589_v43 = vadd.f32 %v1561_v44, %v1429_v39  ;;  %v2122_v47 = vpop.f32.mrb[73].mxu0  ;;  %v2096_v48 = vpop.f32.mrb[73].mxu1 }
 0x178   : > { %v1605_v50 = vadd.f32 %v2589_v13, %v1589_v43 }
 0x179   : > { %v1411_v46 = vpop.f32.mrb[74].mxu1  ;;  %v1566_v49 = vpop.f32.mrb[74].mxu0 }
 0x17a   : > { %1615 = vst.msk [vmem:[%s2594_s16 + $0x20] sm:$0xff] %vm1610_vm3, %v1605_v50  ;;  %v1431_v51 = vadd.f32 %v1411_v46, %v1271_v61  ;;  %v1590_v53 = vadd.f32 %v1566_v49, %v1430_v45  ;;  %v2125_v54 = vpop.f32.mrb[75].mxu0  ;;  %v2099_v52 = vpop.f32.mrb[75].mxu1 }
 0x17c   : > { %v1606_v56 = vadd.f32 %v2589_v13, %v1590_v53 }
 0x17d   : > { %v1416_v55 = vpop.f32.mrb[76].mxu1  ;;  %v1571_v59 = vpop.f32.mrb[76].mxu0 }
 0x17e   : > { %1616 = vst.msk [vmem:[%s2594_s16 + $0x28] sm:$0xff] %vm1610_vm3, %v1606_v56  ;;  %v1432_v57 = vadd.f32 %v1416_v55, %v2581_v4  ;;  %v1591_v60 = vadd.f32 %v1571_v59, %v1431_v51  ;;  %v2128_v58 = vpop.f32.mrb[77].mxu0  ;;  %v2102_v62 = vpop.f32.mrb[77].mxu1 }
 0x180   : > { %v1607_v63 = vadd.f32 %v2589_v13, %v1591_v60 }
 0x181   : > { %v1421_v2 = vpop.f32.mrb[78].mxu1  ;;  %v1576_v61 = vpop.f32.mrb[78].mxu0 }
 0x182   : > { %1617 = vst.msk [vmem:[%s2594_s16 + $0x30] sm:$0xff] %vm1610_vm3, %v1607_v63  ;;  %v1433_v3 = vadd.f32 %v1421_v2, %v2583_v10  ;;  %v1592_v0 = vadd.f32 %v1576_v61, %v1432_v57  ;;  %v2131_v5 = vpop.f32.mrb[79].mxu0  ;;  %v2105_v6 = vpop.f32.mrb[79].mxu1 }
 0x184   : > { %v1608_v8 = vadd.f32 %v2589_v13, %v1592_v0 }
 0x185   : > { %v1581_v9 = vpop.f32.mrb[80].mxu0 }
 0x186   : > { %1618 = vst.msk [vmem:[%s2594_s16 + $0x38] sm:$0xff] %vm1610_vm3, %v1608_v8  ;;  %v1593_v4 = vadd.f32 %v1581_v9, %v1433_v3  ;;  %v2134_v7 = vpop.f32.mrb[81].mxu0 }
 0x188   : > { %v1609_v11 = vadd.f32 %v2589_v13, %v1593_v4 }
 0x18a   : > { %1620 = vst.msk [vmem:[%s2594_s16 + $0x40] sm:$0x3] %vm1619_vm4, %v1609_v11 }
 0x18b PF: > { %s13_s12 = sadd.s32 1, %s2155_s12  }
 0x18c   : > { %p10_p4 = scmp.ge.s32.totalorder %s13_s12, 4  }
 0x18e   :  { %12 = sbr.rel (!%p10_p4) target bundleno = 1 (0x1), region = 70 }

</bundles_post_ra>
